<compile_context>
chip_gen: v6e
topology: v6e:2x2x1
jax: 0.10.0
libtpu: 0.0.40
codegen_flags: <defaults>
</compile_context>

<pallas_src>
import jax
import jax.numpy as jnp
from jax.experimental import pallas as pl
from jax.experimental.pallas import tpu as pltpu


def _round_up(n: int, m: int) -> int:
    return ((n + m - 1) // m) * m


def _ppo_critic_kernel(x_ref, w1_ref, b1_ref, w2_ref, b2_ref, w3_ref, b3_ref, out_ref):
    # ---- Layer 1: (TB, D) @ (D, F) on the MXU, bf16 inputs / f32 accumulation ----
    x = x_ref[...].astype(jnp.bfloat16)
    h1 = jnp.dot(x, w1_ref[...], preferred_element_type=jnp.float32)
    h1 = jnp.maximum(h1 + b1_ref[...], 0.0)          # bias + ReLU in f32

    # ---- Layer 2: (TB, F) @ (F, F) ----
    h2 = jnp.dot(h1.astype(jnp.bfloat16), w2_ref[...], preferred_element_type=jnp.float32)
    h2 = jnp.maximum(h2 + b2_ref[...], 0.0)

    # ---- Output head: VPU multiply + XLU lane-reduce (no MXU pass for 1 column) ----
    v = jnp.sum(h2 * w3_ref[...], axis=-1, keepdims=True) + b3_ref[0, 0]   # (TB, 1) f32

    # Lane-dense store: broadcast the value column across all 128 lanes so the
    # store is a full unmasked vst; the wrapper slices column 0.
    out_ref[...] = jnp.broadcast_to(v, out_ref.shape).astype(out_ref.dtype)


def ppo_critic_forward(x, params, *, block_tb: int = 128):
    """x: (B, input_dim) float32. Returns (B, 1) float32."""
    # In a real training loop, store W1/W2 in bf16 to avoid per-call casts.
    w1 = params["w1"].astype(jnp.bfloat16)
    w2 = params["w2"].astype(jnp.bfloat16)
    b1 = params["b1"].astype(jnp.float32)
    b2 = params["b2"].astype(jnp.float32)
    w3 = params["w3"].reshape(1, -1).astype(jnp.float32)   # (1, F) row for the VPU head
    b3 = params["b3"].reshape(1, 1).astype(jnp.float32)    # scalar -> SMEM

    B, D = x.shape
    F = w1.shape[1]

    # Batch tile: multiple of 16 (bf16 sublane packing), capped at block_tb.
    block_tb = max(16, _round_up(block_tb, 16))
    tb = min(block_tb, _round_up(B, 16))
    b_pad = _round_up(B, tb)
    if b_pad != B:
        x = jnp.pad(x, ((0, b_pad - B), (0, 0)))
    num_tiles = b_pad // tb

    out = pl.pallas_call(
        _ppo_critic_kernel,
        out_shape=jax.ShapeDtypeStruct((b_pad, 128), jnp.float32),
        grid=(num_tiles,),
        in_specs=[
            pl.BlockSpec((tb, D), lambda i: (i, 0)),            # x: streamed over batch
            pl.BlockSpec((D, F), lambda i: (0, 0)),             # W1: resident in VMEM
            pl.BlockSpec((1, F), lambda i: (0, 0)),             # b1: resident
            pl.BlockSpec((F, F), lambda i: (0, 0)),             # W2: resident
            pl.BlockSpec((1, F), lambda i: (0, 0)),             # b2: resident
            pl.BlockSpec((1, F), lambda i: (0, 0)),             # w3 row: resident
            pl.BlockSpec(memory_space=pltpu.MemorySpace.SMEM),  # b3: scalar in SMEM
        ],
        out_specs=pl.BlockSpec((tb, 128), lambda i: (i, 0)),
        compiler_params=pltpu.CompilerParams(
            # Batch tiles are independent -> megacore sharding on v7x, harmless elsewhere.
            dimension_semantics=("parallel",),
        ),
        # TODO(synk): for very large fc_dim on v7x (64 MiB VMEM), tile the F reduction
        # axis ("arbitrary" grid dim) and set vmem_limit_bytes explicitly.
    )(x, w1, b1, w2, b2, w3, b3)

    return out[:B, :1]


def init_params(input_dim, fc_dim, key):
    """Deterministic synthetic parameter init (matches shapes of the torch MLP)."""
    ks = jax.random.split(key, 6)
    scale1 = 1.0 / jnp.sqrt(input_dim)
    scale2 = 1.0 / jnp.sqrt(fc_dim)
    return {
        "w1": jax.random.normal(ks[0], (input_dim, fc_dim), jnp.float32) * scale1,
        "b1": jax.random.normal(ks[1], (1, fc_dim), jnp.float32) * 0.01,
        "w2": jax.random.normal(ks[2], (fc_dim, fc_dim), jnp.float32) * scale2,
        "b2": jax.random.normal(ks[3], (1, fc_dim), jnp.float32) * 0.01,
        "w3": jax.random.normal(ks[4], (fc_dim, 1), jnp.float32) * scale2,
        "b3": jax.random.normal(ks[5], (1, 1), jnp.float32) * 0.01,
    }


def _reference_forward_f32(x, p):
    h1 = jnp.maximum(x @ p["w1"] + p["b1"], 0.0)
    h2 = jnp.maximum(h1 @ p["w2"] + p["b2"], 0.0)
    return h2 @ p["w3"] + p["b3"]


def _reference_forward_bf16(x, p):
    # Same dtype path as the kernel: bf16 MXU inputs, f32 accumulation, f32 elementwise.
    w1 = p["w1"].astype(jnp.bfloat16)
    w2 = p["w2"].astype(jnp.bfloat16)
    h1 = jnp.dot(x.astype(jnp.bfloat16), w1, preferred_element_type=jnp.float32)
    h1 = jnp.maximum(h1 + p["b1"], 0.0)
    h2 = jnp.dot(h1.astype(jnp.bfloat16), w2, preferred_element_type=jnp.float32)
    h2 = jnp.maximum(h2 + p["b2"], 0.0)
    return jnp.sum(h2 * p["w3"].reshape(1, -1), axis=-1, keepdims=True) + p["b3"].reshape(1, 1)


if __name__ == "__main__":
    input_dim = 32
    fc_dim = 32

    key = jax.random.PRNGKey(0)
    k_x, k_p = jax.random.split(key)
    params = init_params(input_dim, fc_dim, k_p)

    # Case 1: tiny batch (single padded batch tile).
    x_small = jax.random.normal(k_x, (8, input_dim), jnp.float32)
    v_small = jax.block_until_ready(ppo_critic_forward(x_small, params))

    # Case 2: ragged batch exercising a multi-step batch grid + tail padding.
    x_big = jax.random.normal(k_x, (40, input_dim), jnp.float32)
    v_big = jax.block_until_ready(ppo_critic_forward(x_big, params, block_tb=16))

    for xx, vv in ((x_small, v_small), (x_big, v_big)):
        assert vv.shape == (xx.shape[0], 1)
        ref_match = _reference_forward_bf16(xx, params)   # same precision path
        ref_f32 = _reference_forward_f32(xx, params)      # torch-equivalent f32 path
        assert jnp.allclose(vv, ref_match, atol=1e-4, rtol=1e-4)
        assert jnp.allclose(vv, ref_f32, atol=1e-1, rtol=5e-2)

    print("KERNEL_OK")
</pallas_src>

<mosaic_0001>
module attributes {stable_mosaic.version = 11 : i64} {
  func.func @_ppo_critic_kernel(%arg0: i32, %arg1: memref<16x32xf32, #tpu.memory_space<vmem>>, %arg2: memref<32x32xbf16, #tpu.memory_space<vmem>>, %arg3: memref<1x32xf32, #tpu.memory_space<vmem>>, %arg4: memref<32x32xbf16, #tpu.memory_space<vmem>>, %arg5: memref<1x32xf32, #tpu.memory_space<vmem>>, %arg6: memref<1x32xf32, #tpu.memory_space<vmem>>, %arg7: memref<1x1xf32, #tpu.memory_space<smem>>, %arg8: memref<16x128xf32, #tpu.memory_space<vmem>>) attributes {dimension_semantics = [#tpu.dimension_semantics<parallel>], iteration_bounds = array<i64: 1>, scalar_prefetch = 0 : i64, scratch_operands = 0 : i64, tpu.core_type = #tpu.core_type<tc>, window_params = [{transform_indices = @transform_0, window_bounds = array<i64: 16, 32>}, {pipeline_mode = #tpu.pipeline_mode<synchronous>, transform_indices = @transform_1, window_bounds = array<i64: 32, 32>}, {pipeline_mode = #tpu.pipeline_mode<synchronous>, transform_indices = @transform_2, window_bounds = array<i64: 1, 32>}, {pipeline_mode = #tpu.pipeline_mode<synchronous>, transform_indices = @transform_3, window_bounds = array<i64: 32, 32>}, {pipeline_mode = #tpu.pipeline_mode<synchronous>, transform_indices = @transform_4, window_bounds = array<i64: 1, 32>}, {pipeline_mode = #tpu.pipeline_mode<synchronous>, transform_indices = @transform_5, window_bounds = array<i64: 1, 32>}, {transform_indices = @transform_6, window_bounds = array<i64: 1, 1>}, {transform_indices = @transform_7, window_bounds = array<i64: 16, 128>}]} {
    %c0 = arith.constant 0 : index
    %c0_0 = arith.constant 0 : index
    %0 = vector.load %arg1[%c0, %c0_0] : memref<16x32xf32, #tpu.memory_space<vmem>>, vector<16x32xf32>
    %1 = arith.truncf %0 : vector<16x32xf32> to vector<16x32xbf16>
    %c0_1 = arith.constant 0 : index
    %c0_2 = arith.constant 0 : index
    %2 = vector.load %arg2[%c0_1, %c0_2] : memref<32x32xbf16, #tpu.memory_space<vmem>>, vector<32x32xbf16>
    %cst = arith.constant dense<0.000000e+00> : vector<16x32xf32>
    %3 = tpu.matmul %1, %2, %cst {dimension_numbers = #tpu.dot_dimension_numbers<[1], [0], [0], [1], [0, 0, 1, 1], [], []>} : vector<16x32xbf16>, vector<32x32xbf16>, vector<16x32xf32> -> vector<16x32xf32>
    %c0_3 = arith.constant 0 : index
    %c0_4 = arith.constant 0 : index
    %4 = vector.load %arg3[%c0_3, %c0_4] : memref<1x32xf32, #tpu.memory_space<vmem>>, vector<1x32xf32>
    %5 = vector.broadcast %4 : vector<1x32xf32> to vector<16x32xf32>
    %6 = arith.addf %3, %5 : vector<16x32xf32>
    %cst_5 = arith.constant 0.000000e+00 : f32
    %7 = vector.broadcast %cst_5 : f32 to vector<16x32xf32>
    %8 = arith.maximumf %6, %7 : vector<16x32xf32>
    %9 = arith.truncf %8 : vector<16x32xf32> to vector<16x32xbf16>
    %c0_6 = arith.constant 0 : index
    %c0_7 = arith.constant 0 : index
    %10 = vector.load %arg4[%c0_6, %c0_7] : memref<32x32xbf16, #tpu.memory_space<vmem>>, vector<32x32xbf16>
    %cst_8 = arith.constant dense<0.000000e+00> : vector<16x32xf32>
    %11 = tpu.matmul %9, %10, %cst_8 {dimension_numbers = #tpu.dot_dimension_numbers<[1], [0], [0], [1], [0, 0, 1, 1], [], []>} : vector<16x32xbf16>, vector<32x32xbf16>, vector<16x32xf32> -> vector<16x32xf32>
    %c0_9 = arith.constant 0 : index
    %c0_10 = arith.constant 0 : index
    %12 = vector.load %arg5[%c0_9, %c0_10] : memref<1x32xf32, #tpu.memory_space<vmem>>, vector<1x32xf32>
    %13 = vector.broadcast %12 : vector<1x32xf32> to vector<16x32xf32>
    %14 = arith.addf %11, %13 : vector<16x32xf32>
    %cst_11 = arith.constant 0.000000e+00 : f32
    %15 = vector.broadcast %cst_11 : f32 to vector<16x32xf32>
    %16 = arith.maximumf %14, %15 : vector<16x32xf32>
    %c0_12 = arith.constant 0 : index
    %c0_13 = arith.constant 0 : index
    %17 = vector.load %arg6[%c0_12, %c0_13] : memref<1x32xf32, #tpu.memory_space<vmem>>, vector<1x32xf32>
    %18 = vector.broadcast %17 : vector<1x32xf32> to vector<16x32xf32>
    %19 = arith.mulf %16, %18 : vector<16x32xf32>
    %cst_14 = arith.constant dense<0.000000e+00> : vector<16xf32>
    %20 = vector.multi_reduction <add>, %19, %cst_14 [1] : vector<16x32xf32> to vector<16xf32>
    %21 = vector.shape_cast %20 : vector<16xf32> to vector<16x1xf32>
    %c0_15 = arith.constant 0 : index
    %c0_16 = arith.constant 0 : index
    %22 = memref.load %arg7[%c0_15, %c0_16] : memref<1x1xf32, #tpu.memory_space<smem>>
    %23 = vector.broadcast %22 : f32 to vector<16x1xf32>
    %24 = arith.addf %21, %23 : vector<16x1xf32>
    %25 = vector.shape_cast %24 : vector<16x1xf32> to vector<16x1xf32>
    %26 = vector.broadcast %25 : vector<16x1xf32> to vector<16x128xf32>
    %c0_17 = arith.constant 0 : index
    %c0_18 = arith.constant 0 : index
    %27 = vector.load %arg8[%c0_17, %c0_18] : memref<16x128xf32, #tpu.memory_space<vmem>>, vector<16x128xf32>
    tpu.vector_store %arg8[%c0_17, %c0_18], %26 {strides = array<i32>} : memref<16x128xf32, #tpu.memory_space<vmem>>, vector<16x128xf32>,
    return
  }
  func.func @transform_0(%arg0: i32) -> (i32, i32) {
    %c0_i32 = arith.constant 0 : i32
    %c0_i32_0 = arith.constant 0 : i32
    return %arg0, %c0_i32 : i32, i32
  }
  func.func @transform_1(%arg0: i32) -> (i32, i32) {
    %c0_i32 = arith.constant 0 : i32
    %c0_i32_0 = arith.constant 0 : i32
    %c0_i32_1 = arith.constant 0 : i32
    return %c0_i32, %c0_i32_0 : i32, i32
  }
  func.func @transform_2(%arg0: i32) -> (i32, i32) {
    %c0_i32 = arith.constant 0 : i32
    %c0_i32_0 = arith.constant 0 : i32
    %c0_i32_1 = arith.constant 0 : i32
    return %c0_i32, %c0_i32_0 : i32, i32
  }
  func.func @transform_3(%arg0: i32) -> (i32, i32) {
    %c0_i32 = arith.constant 0 : i32
    %c0_i32_0 = arith.constant 0 : i32
    %c0_i32_1 = arith.constant 0 : i32
    return %c0_i32, %c0_i32_0 : i32, i32
  }
  func.func @transform_4(%arg0: i32) -> (i32, i32) {
    %c0_i32 = arith.constant 0 : i32
    %c0_i32_0 = arith.constant 0 : i32
    %c0_i32_1 = arith.constant 0 : i32
    return %c0_i32, %c0_i32_0 : i32, i32
  }
  func.func @transform_5(%arg0: i32) -> (i32, i32) {
    %c0_i32 = arith.constant 0 : i32
    %c0_i32_0 = arith.constant 0 : i32
    %c0_i32_1 = arith.constant 0 : i32
    return %c0_i32, %c0_i32_0 : i32, i32
  }
  func.func @transform_6(%arg0: i32) -> (i32, i32) {
    %c0_i32 = arith.constant 0 : i32
    %c0_i32_0 = arith.constant 0 : i32
    %c0_i32_1 = arith.constant 0 : i32
    return %c0_i32, %c0_i32_0 : i32, i32
  }
  func.func @transform_7(%arg0: i32) -> (i32, i32) {
    %c0_i32 = arith.constant 0 : i32
    %c0_i32_0 = arith.constant 0 : i32
    return %arg0, %c0_i32 : i32, i32
  }
}

</mosaic_0001>

<bundles_post_ra>
// kernel: tpu_custom_call.1
= control target key start
LH: loop header
LB: loop body
LE: loop exit
PB: predicated region body
PF: predicated region fallthrough
CT: control target
= control target key end

     0   :  { %13 = vsyncpa [#allocation4], 0  ;;  %s467_s0 = inlined_call_operand.hbm [shape: f32[16,32], index: 0, kind: input, shape index: {}]   ;;  %s468_s1 = inlined_call_operand.hbm [shape: bf16[32,32], index: 1, kind: input, shape index: {}]   ;;  %s469_s2 = inlined_call_operand.vmem [shape: f32[1,32], index: 2, kind: input, shape index: {}]   ;;  %s470_s3 = inlined_call_operand.hbm [shape: bf16[32,32], index: 3, kind: input, shape index: {}]   ;;  %s471_s4 = inlined_call_operand.vmem [shape: f32[1,32], index: 4, kind: input, shape index: {}]   ;;  %s472_s5 = inlined_call_operand.vmem [shape: f32[1,32], index: 5, kind: input, shape index: {}]   ;;  %s473_s6 = inlined_call_operand.<no memory space> [shape: f32[1,1], index: 6, kind: input, shape index: {}]   ;;  %s474_s7 = inlined_call_operand.hbm [shape: f32[16,128], index: 7, kind: output, shape index: {}]  }
   0x1   :  { %14 = vsyncpa [#allocation7], 0 }
   0x2   :  { %15 = vsyncpa [#allocation5], 0  ;;  %s383_s24 = smov [#allocation6]  }
   0x3   :  { %s33_s25 = sshll.u32 %s383_s24, 4  ;;  %s34_s25 = int_to_ptr.vmem [resolvable:$true] %s33_s25 }
   0x4   :  { %s305_s26 = scalar_lea.vmem %s34_s25, 256  ;;  %p310_p1 = scmp.lt.s32.totalorder %s34_s25, %s34_s25 }
   0x5   :  { %p306_p0 = scmp.ne.s32.totalorder %s34_s25, %s305_s26  ;;  %p311_p2 = scmp.lt.s32.totalorder %s305_s26, %s305_s26 }
   0x7   :  { %p312_p3 = por %p311_p2, %p310_p1 }
   0x9   :  { %p313_p4 = pnand %p312_p3, %p306_p0 }
   0xb   :  { %316 = shalt.err (!%p313_p4)
}
   0xc   :  { %s384_s27 = smov 64   ;;  %s385_s28 = smov 4  }
   0xd   :  { %39 = dma.hbm_to_vmem [thread:$0]  %s468_s1, 256, %s34_s25, [#allocation7], %s384_s27, %s384_s27, %s385_s28  }
   0xe   :  { %s386_s8 = smov [#allocation3]  }
   0xf   :  { %s21_s9 = sshll.u32 %s386_s8, 4  ;;  %s22_s9 = int_to_ptr.vmem [resolvable:$true] %s21_s9 }
  0x10   :  { %s325_s10 = scalar_lea.vmem %s22_s9, 256  ;;  %p330_p6 = scmp.lt.s32.totalorder %s22_s9, %s22_s9 }
  0x11   :  { %p326_p5 = scmp.ne.s32.totalorder %s22_s9, %s325_s10  ;;  %p331_p7 = scmp.lt.s32.totalorder %s325_s10, %s325_s10 }
  0x13   :  { %p332_p8 = por %p331_p7, %p330_p6 }
  0x15   :  { %p333_p9 = pnand %p332_p8, %p326_p5 }
  0x17   :  { %336 = shalt.err (!%p333_p9)
}
  0x18   :  { %s387_s11 = smov 128   ;;  %s388_s12 = smov 8  }
  0x19   :  { %27 = dma.hbm_to_vmem [thread:$0]  %s467_s0, 256, %s22_s9, [#allocation4], %s387_s11, %s387_s11, %s388_s12  }
  0x1a   :  { %s389_s1 = smov [#allocation8]  }
  0x1b   :  { %s47_s15 = sshll.u32 %s389_s1, 4  ;;  %s48_s15 = int_to_ptr.vmem [resolvable:$true] %s47_s15 }
  0x1c   :  { %s345_s16 = scalar_lea.vmem %s48_s15, 256  ;;  %p350_p11 = scmp.lt.s32.totalorder %s48_s15, %s48_s15 }
  0x1d   :  { %p346_p10 = scmp.ne.s32.totalorder %s48_s15, %s345_s16  ;;  %p351_p12 = scmp.lt.s32.totalorder %s345_s16, %s345_s16 }
  0x1f   :  { %p352_p13 = por %p351_p12, %p350_p11 }
  0x21   :  { %p353_p0 = pnand %p352_p13, %p346_p10 }
  0x23   :  { %356 = shalt.err (!%p353_p0)
}
  0x24   :  { %53 = dma.hbm_to_vmem [thread:$0]  %s470_s3, 256, %s48_s15, [#allocation7], %s384_s27, %s384_s27, %s385_s28  }
  0x25   :  { %377 = dma.done.wait [#allocation4], 256  }
  0x26   :  { %378 = vsyncadd [#allocation4], 4294967040 }
  0x27   :  { %379 = dma.done.wait [#allocation7], 512  }
  0x28   :  { %380 = vsyncadd [#allocation7], 4294966784  ;;  %v390_v0 = vmov 0.0   ;;  %vm391_vm0 = vmmov 0   ;;  %v293_v1 = vld [vmem:[#allocation6 + $0x8] sm:$0xff]   ;;  %v294_v2 = vld [vmem:[#allocation6] sm:$0xff]   ;;  %v229_v32 = vstv %s473_s6 }
  0x29   :  { %267 = vmatprep.subr.bf16.mxu0 %v390_v0  ;;  %271 = vmatprep.mubr.msk.bf16.mxu0 %vm391_vm0, %v390_v0  ;;  %v70_v3 = vld [vmem:[#allocation3] sm:$0xff]  ;;  %v71_v4 = vld [vmem:[#allocation3 + $0x8] sm:$0xff]  ;;  %vm96_vm1 = vcmask 261120  }
  0x2a   :  { %275 = vmatprep.subr.bf16.mxu1 %v390_v0  ;;  %279 = vmatprep.mubr.msk.bf16.mxu1 %vm391_vm0, %v390_v0  ;;  %v72_v5 = vpack.c.bf16 %v71_v4, %v70_v3  ;;  %v295_v6 = vld [vmem:[#allocation8 + $0x8] sm:$0xff]   ;;  %v296_v7 = vld [vmem:[#allocation8] sm:$0xff]  }
  0x2b   :  { %268 = vmatpush3.bf16.msra.mxu0 %v293_v1  ;;  %276 = vmatpush3.bf16.msra.mxu1 %v295_v6  ;;  %v252_v8 = vld [vmem:[%s469_s2] ss:$0 sm:$0xff] }
  0x2c   :  { %269 = vmatprep.subr.bf16.mxu0 %v390_v0  ;;  %277 = vmatprep.subr.bf16.mxu1 %v390_v0  ;;  %v256_v18 = vld [vmem:[%s471_s4] ss:$0 sm:$0xff] }
  0x2d   :  { %v260_v22 = vld [vmem:[%s472_s5] ss:$0 sm:$0xff]  ;;  %s392_s5 = smov [#allocation9]  }
  0x2e   :  { %s239_s23 = sshll.u32 %s392_s5, 4  ;;  %s240_s23 = int_to_ptr.vmem [resolvable:$true] %s239_s23 }
  0x2f   :  { %270 = vmatpush3.bf16.msra.mxu0 %v294_v2  ;;  %278 = vmatpush3.bf16.msra.mxu1 %v296_v7  ;;  %s357_s24 = scalar_lea.vmem %s240_s23, 256  ;;  %p362_p2 = scmp.lt.s32.totalorder %s240_s23, %s240_s23 }
  0x30   :  { %p358_p1 = scmp.ne.s32.totalorder %s240_s23, %s357_s24  ;;  %p363_p3 = scmp.lt.s32.totalorder %s357_s24, %s357_s24 }
  0x32   :  { %272 = vmatmul.mubr.msk.bf16.vlgmr.msra.gmra.mxu0 %vm96_vm1, %v72_v5  ;;  %p364_p4 = por %p363_p3, %p362_p2 }
  0x34   :  { %p365_p5 = pnand %p364_p4, %p358_p1 }
  0xf2   :  { %v134_v9 = vpop.f32.mrf.mxu0 }
  0xf3   :  { %v135_v11 = vadd.f32 %v252_v8, %v134_v9 }
  0xf4   :  { %v273_v10 = vpop.f32.mrf.mxu0 }
  0xf5   :  { %v141_v15 = vmax.f32 %v135_v11, 0.0 }
  0xf6   :  { %v137_v12 = vpop.f32.mrf.mxu0 }
  0xf7   :  { %v138_v13 = vadd.f32 %v252_v8, %v137_v12 }
  0xf8   :  { %v274_v14 = vpop.f32.mrf.mxu0 }
  0xf9   :  { %v142_v16 = vmax.f32 %v138_v13, 0.0 }
  0xfb   :  { %v143_v17 = vpack.c.bf16 %v142_v16, %v141_v15 }
  0xfd   :  { %280 = vmatmul.mubr.msk.bf16.vlgmr.msra.gmra.mxu1 %vm96_vm1, %v143_v17 }
 0x1bd   :  { %v204_v19 = vpop.f32.mrf.mxu1 }
 0x1be   :  { %v205_v20 = vadd.f32 %v256_v18, %v204_v19 }
 0x1bf   :  { %v281_v21 = vpop.f32.mrf.mxu1 }
 0x1c0   :  { %v211_v23 = vmax.f32 %v205_v20, 0.0 }
 0x1c1   :  { %v207_v24 = vpop.f32.mrf.mxu1 }
 0x1c2   :  { %v208_v25 = vadd.f32 %v256_v18, %v207_v24  ;;  %v220_v26 = vmul.f32 %v260_v22, %v211_v23 }
 0x1c3   :  { %v282_v27 = vpop.f32.mrf.mxu1 }
 0x1c4   :  { %v212_v28 = vmax.f32 %v208_v25, 0.0  ;;  %v222_v29 = vsel %vm96_vm1, %v220_v26, 0.0 }
 0x1c5   :  { %223 = vadd.xlane.f32.xlu0 %v222_v29 }
 0x1c6   :  { %v221_v30 = vmul.f32 %v260_v22, %v212_v28 }
 0x1c8   :  { %v225_v31 = vsel %vm96_vm1, %v221_v30, 0.0 }
 0x1c9   :  { %226 = vadd.xlane.f32.xlu0 %v225_v31 }
 0x24e   :  { %v224_v33 = vpop.xlane.xlu0 %223 }
 0x24f   :  { %v230_v34 = vadd.f32 %v229_v32, %v224_v33 }
 0x251   :  { %232 = vst [vmem:[#allocation9] sm:$0xff] %v230_v34 }
 0x252   :  { %v227_v35 = vpop.xlane.xlu0 %226 }
 0x253   :  { %v231_v36 = vadd.f32 %v229_v32, %v227_v35 }
 0x255   :  { %233 = vst [vmem:[#allocation9 + $0x8] sm:$0xff] %v231_v36 }
 0x256   :  { %368 = shalt.err (!%p365_p5)
}
 0x257   :  { %245 = dma.vmem_to_hbm [thread:$0]  %s240_s23, 256, %s474_s7, [#allocation5], %s387_s11, %s387_s11, %s388_s12  }
 0x258   :  { %381 = dma.done.wait [#allocation5], 256  }
 0x259   :  { %382 = vsyncadd [#allocation5], 4294967040 }
 0x25a   :  { %249 = vsyncpa [#allocation4], 1 }
 0x25b   :  { %250 = vsyncpa [#allocation7], 1 }
 0x25c   :  { %251 = vsyncpa [#allocation5], 1 }

</bundles_post_ra>
